<compile_context>
chip_gen: v7x
topology: tpu7x:2x2x1
jax: 0.10.0
libtpu: 0.0.40
codegen_flags: <defaults>
</compile_context>

<pallas_src>
import functools

import jax
import jax.numpy as jnp
from jax import lax
from jax.experimental import pallas as pl
from jax.experimental.pallas import tpu as pltpu


def _conv_padding(convolutional_config):
    kernel_size = convolutional_config["kernel_size"]
    padding_str = convolutional_config["padding"]
    if padding_str == "zero":
        return (kernel_size + 1) // 2 - 1
    elif padding_str in (None, False):
        return 0
    raise ValueError(f"Unknown padding value '{padding_str}'")


def _round_up(x, m):
    return ((x + m - 1) // m) * m


def _vmem_capacity_bytes():
    try:
        return int(pltpu.get_tpu_info().vmem_capacity_bytes)
    except Exception:
        return 128 << 20                      # v5e / v6e default; v7x reports 64 MiB


# ----------------------------- Pallas kernel ------------------------------ #

def _fused_cnn_kernel(x_ref, pos_ref, w_ref, b_ref, o_ref, act_ref, *,
                      kernel_size, pad, seg, bt, W, margin,
                      n_layers, n_hidden, l_in0, use_fori):
    """All conv layers for one batch tile; activations resident in VMEM.

    x_ref  : (1, c_max, W)                 host-padded, lane-concatenated input
    pos_ref: (1, W)                        lane -> position within its segment
                                           (dead alignment lanes carry `seg`)
    w_ref  : (n_layers, K, c_max, c_max)   per-layer, per-tap weight matrices
    b_ref  : (n_layers, c_max, 1)          per-layer biases (f32)
    o_ref  : (1, c_max, W)                 lane-dense output slab
    act_ref: (c_max, S_w)                  activation scratch

    Scratch layout: writebacks land at the 128-aligned offset `margin`
    (lane-aligned dense stores); layer reads use windows starting at
    `margin - pad + k`, so per-segment zero padding never has to be re-built.
    """
    K = kernel_size
    R = margin - pad                       # read-window base offset (>= 0)

    # Prologue: zero the scratch once (covers all padding + alignment tail),
    # then one dense copy of the host-prepared slab.
    act_ref[...] = jnp.zeros_like(act_ref)
    act_ref[:, R:R + W] = x_ref[0]

    def conv(w_i, b_i):
        # K accumulating MXU pushes over lane-shifted windows (no im2col slab).
        acc = jnp.dot(w_i[0], act_ref[:, R:R + W],
                      preferred_element_type=jnp.float32)
        for k in range(1, K):
            acc = acc + jnp.dot(w_i[k], act_ref[:, R + k:R + k + W],
                                preferred_element_type=jnp.float32)
        return acc + b_i

    def writeback(y, l_out):
        # Single lane-dense, lane-aligned store; the select zeroes every lane
        # belonging to a segment's padding region (or the 128-alignment tail)
        # so it cannot poison the next layer.
        mask = pos_ref[...] < l_out
        act_ref[:, margin:margin + W] = jnp.where(mask, y, 0.0).astype(act_ref.dtype)

    def run_layer(i, l_in):
        l_out = l_in + 2 * pad - K + 1
        y = conv(w_ref[i], b_ref[i])
        if i < n_hidden:
            # TODO(synk): add_activation_and_regularization_layers source not
            # provided; assuming ReLU, no batchnorm / dropout / spectral-norm.
            y = jnp.maximum(y, 0.0)
        if i == n_layers - 1:
            o_ref[0] = y.astype(o_ref.dtype)
        else:
            writeback(y, l_out)
        return l_out

    if use_fori:
        # Deep stack with constant sequence length: one tight, schedulable body
        # instead of full unrolling (bounds vreg live ranges / code size).
        l_out = l_in0 + 2 * pad - K + 1
        mask = pos_ref[...] < l_out
        n_loop = n_hidden if n_layers > n_hidden else n_hidden - 1

        def body(i, carry):
            y = jnp.maximum(conv(w_ref[i], b_ref[i]), 0.0)
            act_ref[:, margin:margin + W] = jnp.where(mask, y, 0.0).astype(act_ref.dtype)
            return carry

        lax.fori_loop(0, n_loop, body, 0)
        l_in = l_in0
        for i in range(n_loop, n_layers):
            l_in = run_layer(i, l_in)
    else:
        l_in = l_in0
        for i in range(n_layers):
            l_in = run_layer(i, l_in)


# ------------------------------- wrapper ----------------------------------- #

def _choose_batch_tile(batch, seg, c_max, kernel_size, pad, act_bytes, budget):
    """Largest divisor of `batch` whose tile fits the VMEM budget, subject to
    n_tiles >= 2 whenever batch >= 2 (so v7x's two TensorCores both get work)
    and a lane-width cap (past MXU-N saturation, more width only costs VMEM)."""
    margin = _round_up(pad, 128) if pad > 0 else 0
    best = 1
    for bt in range(1, batch + 1):
        if batch % bt:
            continue
        if batch >= 2 and batch // bt < 2:
            continue
        w_live = bt * seg
        if w_live > 4096:
            continue
        w_pad = _round_up(w_live, 128)
        s_w = _round_up(margin + w_pad + kernel_size - 1 - pad, 128)
        scratch = c_max * s_w * act_bytes
        io = 2 * 2 * c_max * w_pad * max(act_bytes, 4)   # dbl-buffered in + out
        if scratch + io > budget:
            continue
        best = bt
    return best


def _pack_layer_params(params, c_max, kernel_size, dtype):
    """Weights -> (n_layers, K, c_max, c_max) per-tap matrices; biases ->
    (n_layers, c_max, 1) f32.  Zero padding keeps unused channels inert."""
    w_packed, b_packed = [], []
    for (w, b) in params:
        c_out, c_in, k = w.shape
        assert k == kernel_size
        wt = jnp.transpose(w, (2, 0, 1))                       # (K, c_out, c_in)
        wt = jnp.pad(wt, ((0, 0), (0, c_max - c_out), (0, c_max - c_in)))
        w_packed.append(wt)
        b_packed.append(jnp.pad(b, (0, c_max - c_out)).reshape(c_max, 1))
    return (jnp.stack(w_packed).astype(dtype),
            jnp.stack(b_packed).astype(jnp.float32))


def time_series_cnn_forward(x, params, convolutional_config, out_features,
                            act_dtype=jnp.float32):
    """x: (B, in_features, L) -> (B, 1, L_out) (or (B, num_channels, L_out) if
    out_features is None).  One fused Pallas kernel runs every conv layer.
    act_dtype=jnp.bfloat16 halves VMEM / load-store traffic on v6e / v7x
    (accumulation stays f32); the default keeps full f32 precision."""
    kernel_size = convolutional_config["kernel_size"]
    num_layers = convolutional_config["num_layers"]
    pad = _conv_padding(convolutional_config)

    B, c_in0, L = x.shape
    n_layers = len(params)
    n_hidden = num_layers
    assert n_layers == num_layers + (1 if out_features is not None else 0)

    act_bytes = jnp.dtype(act_dtype).itemsize
    sublane = (8 * 4) // act_bytes                   # 8 for f32, 16 for bf16
    c_max = _round_up(max([c_in0] + [w.shape[0] for (w, _) in params]), sublane)
    c_last = params[-1][0].shape[0]

    seg = L + 2 * pad                      # lane stride of one padded segment
    margin = _round_up(pad, 128) if pad > 0 else 0

    cap = _vmem_capacity_bytes()
    budget = max(2 << 20, min(cap // 8, 16 << 20))            # generation aware
    bt = _choose_batch_tile(B, seg, c_max, kernel_size, pad, act_bytes, budget)
    n_tiles = B // bt
    W_live = bt * seg
    W = _round_up(W_live, 128)                                # lane-dense width
    S_w = _round_up(margin + W + kernel_size - 1 - pad, 128)

    l_final = L
    for _ in range(n_layers):
        l_final = l_final + 2 * pad - kernel_size + 1
    assert l_final > 0
    # NOTE: very large L * num_channels would need an L-halo tiling fallback;
    # this version keeps one full padded sequence per tile resident in VMEM.

    # ---- host-side layout plumbing only (pad + reshape, no compute) ----
    x_p = jnp.pad(x, ((0, 0), (0, c_max - c_in0), (pad, pad))).astype(act_dtype)
    x_slab = x_p.reshape(n_tiles, bt, c_max, seg).transpose(0, 2, 1, 3)
    x_slab = x_slab.reshape(n_tiles, c_max, W_live)
    if W > W_live:
        x_slab = jnp.pad(x_slab, ((0, 0), (0, 0), (0, W - W_live)))

    # Per-lane position inside its batch segment (dead alignment lanes -> seg,
    # so they always fail the `< l_out` validity test inside the kernel).
    lane = jnp.arange(W, dtype=jnp.int32)
    pos = jnp.where(lane < W_live, lane % seg, seg).reshape(1, W).astype(jnp.int32)

    w_all, b_all = _pack_layer_params(params, c_max, kernel_size, act_dtype)

    use_fori = (n_hidden > 4) and (2 * pad == kernel_size - 1)

    kernel = functools.partial(
        _fused_cnn_kernel,
        kernel_size=kernel_size, pad=pad, seg=seg, bt=bt, W=W, margin=margin,
        n_layers=n_layers, n_hidden=n_hidden, l_in0=L, use_fori=use_fori)

    # Explicit VMEM limit: scratch + double-buffered in/out blocks + params,
    # with headroom, clamped to half the physical capacity (v7x-safe).
    need = (c_max * S_w * act_bytes
            + 4 * c_max * W * max(act_bytes, 4)
            + w_all.size * act_bytes + b_all.size * 4 + 8 * W)
    vmem_limit = int(min(max(need + (8 << 20), 32 << 20), cap // 2))

    out = pl.pallas_call(
        kernel,
        out_shape=jax.ShapeDtypeStruct((n_tiles, c_max, W), x.dtype),
        grid_spec=pltpu.PrefetchScalarGridSpec(
            num_scalar_prefetch=0,
            grid=(n_tiles,),
            in_specs=[
                pl.BlockSpec((1, c_max, W), lambda t: (t, 0, 0)),
                pl.BlockSpec((1, W), lambda t: (0, 0)),
                pl.BlockSpec(w_all.shape, lambda t: (0, 0, 0, 0)),
                pl.BlockSpec(b_all.shape, lambda t: (0, 0, 0)),
            ],
            out_specs=pl.BlockSpec((1, c_max, W), lambda t: (t, 0, 0)),
            scratch_shapes=[pltpu.VMEM((c_max, S_w), act_dtype)],
        ),
        compiler_params=pltpu.CompilerParams(
            dimension_semantics=("parallel",),
            vmem_limit_bytes=vmem_limit,
        ),
    )(x_slab, pos, w_all, b_all)

    # Layout plumbing: drop padded channels / alignment lanes, un-concatenate
    # the batch segments back to (B, C_out, L_out).
    out = out[:, :c_last, :W_live].reshape(n_tiles, c_last, bt, seg)
    out = out[..., :l_final].transpose(0, 2, 1, 3).reshape(B, c_last, l_final)
    return out


# --------------------------- parameter init -------------------------------- #

def init_params(key, in_features, convolutional_config, out_features):
    """Deterministic parameter init mirroring the PyTorch module's shapes."""
    num_layers = convolutional_config["num_layers"]
    num_channels = convolutional_config["num_channels"]
    kernel_size = convolutional_config["kernel_size"]

    params = []
    c_in = in_features
    for _ in range(num_layers):
        key, kw, kb = jax.random.split(key, 3)
        fan_in = c_in * kernel_size
        bound = 1.0 / jnp.sqrt(fan_in)
        w = jax.random.uniform(
            kw, (num_channels, c_in, kernel_size), jnp.float32, -bound, bound)
        b = jax.random.uniform(kb, (num_channels,), jnp.float32, -bound, bound)
        params.append((w, b))
        c_in = num_channels

    if out_features is not None:
        key, kw, kb = jax.random.split(key, 3)
        fan_in = num_channels * kernel_size
        bound = 1.0 / jnp.sqrt(fan_in)
        w = jax.random.uniform(
            kw, (1, num_channels, kernel_size), jnp.float32, -bound, bound)
        b = jax.random.uniform(kb, (1,), jnp.float32, -bound, bound)
        params.append((w, b))
    return params


def reference_forward(x, params, convolutional_config, out_features):
    """Pure-JAX reference (lax.conv) for correctness checking."""
    kernel_size = convolutional_config["kernel_size"]
    pad = _conv_padding(convolutional_config)
    num_layers = convolutional_config["num_layers"]
    dn = lax.conv_dimension_numbers(x.shape, params[0][0].shape,
                                    ("NCW", "OIW", "NCW"))
    for i, (w, b) in enumerate(params):
        x = lax.conv_general_dilated(
            x, w, window_strides=(1,), padding=[(pad, pad)],
            dimension_numbers=dn,
        ) + b.reshape(1, -1, 1)
        if i < num_layers:
            x = jnp.maximum(x, 0.0)
    return x


# --------------------------------- main ------------------------------------ #

if __name__ == "__main__":
    convolutional_config = {
        "num_layers": 2,
        "num_channels": 8,
        "kernel_size": 3,
        "padding": "zero",
    }
    regularization_config = {"spectral_norm": False, "batch_norm": False,
                             "dropout": 0.0}
    in_features = 4
    out_features = 1      # not None -> last Conv1d(num_channels -> 1) appended
    batch, seq_len = 4, 16

    key = jax.random.PRNGKey(0)
    key, kx = jax.random.split(key)
    x = jax.random.normal(kx, (batch, in_features, seq_len), jnp.float32)

    params = init_params(key, in_features, convolutional_config, out_features)

    out = time_series_cnn_forward(x, params, convolutional_config, out_features)
    out = jax.block_until_ready(out)

    ref = reference_forward(x, params, convolutional_config, out_features)
    assert out.shape == (batch, 1, seq_len), out.shape
    assert jnp.allclose(out, ref, atol=1e-5, rtol=1e-5), "mismatch vs JAX reference"

    print("KERNEL_OK")
</pallas_src>

<mosaic_0001>
module attributes {stable_mosaic.version = 11 : i64} {
  func.func @_fused_cnn_kernel(%arg0: i32, %arg1: memref<1x8x128xf32, #tpu.memory_space<vmem>>, %arg2: memref<1x128xi32, #tpu.memory_space<vmem>>, %arg3: memref<3x3x8x8xf32, #tpu.memory_space<vmem>>, %arg4: memref<3x8x1xf32, #tpu.memory_space<vmem>>, %arg5: memref<1x8x128xf32, #tpu.memory_space<vmem>>, %arg6: memref<8x384xf32, #tpu.memory_space<vmem>>) attributes {dimension_semantics = [#tpu.dimension_semantics<parallel>], iteration_bounds = array<i64: 2>, scalar_prefetch = 0 : i64, scratch_operands = 1 : i64, tpu.core_type = #tpu.core_type<tc>, window_params = [{transform_indices = @transform_0, window_bounds = array<i64: 1, 8, 128>}, {pipeline_mode = #tpu.pipeline_mode<synchronous>, transform_indices = @transform_1, window_bounds = array<i64: 1, 128>}, {pipeline_mode = #tpu.pipeline_mode<synchronous>, transform_indices = @transform_2, window_bounds = array<i64: 3, 3, 8, 8>}, {pipeline_mode = #tpu.pipeline_mode<synchronous>, transform_indices = @transform_3, window_bounds = array<i64: 3, 8, 1>}, {transform_indices = @transform_4, window_bounds = array<i64: 1, 8, 128>}]} {
    %cst = arith.constant 0.000000e+00 : f32
    %0 = vector.broadcast %cst : f32 to vector<8x384xf32>
    %c0 = arith.constant 0 : index
    %c0_0 = arith.constant 0 : index
    %1 = vector.load %arg6[%c0, %c0_0] : memref<8x384xf32, #tpu.memory_space<vmem>>, vector<8x384xf32>
    tpu.vector_store %arg6[%c0, %c0_0], %0 {strides = array<i32>} : memref<8x384xf32, #tpu.memory_space<vmem>>, vector<8x384xf32>,
    %c0_1 = arith.constant 0 : index
    %c0_2 = arith.constant 0 : index
    %c0_3 = arith.constant 0 : index
    %2 = vector.load %arg1[%c0_1, %c0_2, %c0_3] : memref<1x8x128xf32, #tpu.memory_space<vmem>>, vector<1x8x128xf32>
    %3 = vector.shape_cast %2 : vector<1x8x128xf32> to vector<8x128xf32>
    %c0_4 = arith.constant 0 : index
    %c127 = arith.constant 127 : index
    %4 = vector.load %arg6[%c0_4, %c127] : memref<8x384xf32, #tpu.memory_space<vmem>>, vector<8x128xf32>
    tpu.vector_store %arg6[%c0_4, %c127], %3 {strides = array<i32>} : memref<8x384xf32, #tpu.memory_space<vmem>>, vector<8x128xf32>,
    %c0_5 = arith.constant 0 : index
    %c0_6 = arith.constant 0 : index
    %c0_7 = arith.constant 0 : index
    %c0_8 = arith.constant 0 : index
    %5 = vector.load %arg3[%c0_5, %c0_6, %c0_7, %c0_8] : memref<3x3x8x8xf32, #tpu.memory_space<vmem>>, vector<1x3x8x8xf32>
    %6 = vector.shape_cast %5 : vector<1x3x8x8xf32> to vector<3x8x8xf32>
    %c0_9 = arith.constant 0 : index
    %c0_10 = arith.constant 0 : index
    %c0_11 = arith.constant 0 : index
    %7 = vector.load %arg4[%c0_9, %c0_10, %c0_11] : memref<3x8x1xf32, #tpu.memory_space<vmem>>, vector<1x8x1xf32>
    %8 = vector.shape_cast %7 : vector<1x8x1xf32> to vector<8x1xf32>
    %9 = vector.extract_strided_slice %6 {offsets = [0, 0, 0], sizes = [1, 8, 8], strides = [1, 1, 1]} : vector<3x8x8xf32> to vector<1x8x8xf32>
    %10 = vector.shape_cast %9 : vector<1x8x8xf32> to vector<8x8xf32>
    %c0_12 = arith.constant 0 : index
    %c127_13 = arith.constant 127 : index
    %11 = vector.load %arg6[%c0_12, %c127_13] : memref<8x384xf32, #tpu.memory_space<vmem>>, vector<8x128xf32>
    %cst_14 = arith.constant dense<0.000000e+00> : vector<8x128xf32>
    %12 = tpu.matmul %10, %11, %cst_14 {dimension_numbers = #tpu.dot_dimension_numbers<[1], [0], [0], [1], [0, 0, 1, 1], [], []>} : vector<8x8xf32>, vector<8x128xf32>, vector<8x128xf32> -> vector<8x128xf32>
    %13 = vector.extract_strided_slice %6 {offsets = [1, 0, 0], sizes = [1, 8, 8], strides = [1, 1, 1]} : vector<3x8x8xf32> to vector<1x8x8xf32>
    %14 = vector.shape_cast %13 : vector<1x8x8xf32> to vector<8x8xf32>
    %c0_15 = arith.constant 0 : index
    %c128 = arith.constant 128 : index
    %15 = vector.load %arg6[%c0_15, %c128] : memref<8x384xf32, #tpu.memory_space<vmem>>, vector<8x128xf32>
    %cst_16 = arith.constant dense<0.000000e+00> : vector<8x128xf32>
    %16 = tpu.matmul %14, %15, %cst_16 {dimension_numbers = #tpu.dot_dimension_numbers<[1], [0], [0], [1], [0, 0, 1, 1], [], []>} : vector<8x8xf32>, vector<8x128xf32>, vector<8x128xf32> -> vector<8x128xf32>
    %17 = arith.addf %12, %16 : vector<8x128xf32>
    %18 = vector.extract_strided_slice %6 {offsets = [2, 0, 0], sizes = [1, 8, 8], strides = [1, 1, 1]} : vector<3x8x8xf32> to vector<1x8x8xf32>
    %19 = vector.shape_cast %18 : vector<1x8x8xf32> to vector<8x8xf32>
    %c0_17 = arith.constant 0 : index
    %c129 = arith.constant 129 : index
    %20 = vector.load %arg6[%c0_17, %c129] : memref<8x384xf32, #tpu.memory_space<vmem>>, vector<8x128xf32>
    %cst_18 = arith.constant dense<0.000000e+00> : vector<8x128xf32>
    %21 = tpu.matmul %19, %20, %cst_18 {dimension_numbers = #tpu.dot_dimension_numbers<[1], [0], [0], [1], [0, 0, 1, 1], [], []>} : vector<8x8xf32>, vector<8x128xf32>, vector<8x128xf32> -> vector<8x128xf32>
    %22 = arith.addf %17, %21 : vector<8x128xf32>
    %23 = vector.broadcast %8 : vector<8x1xf32> to vector<8x128xf32>
    %24 = arith.addf %22, %23 : vector<8x128xf32>
    %cst_19 = arith.constant 0.000000e+00 : f32
    %25 = vector.broadcast %cst_19 : f32 to vector<8x128xf32>
    %26 = arith.maximumf %24, %25 : vector<8x128xf32>
    %c0_20 = arith.constant 0 : index
    %c0_21 = arith.constant 0 : index
    %27 = vector.load %arg2[%c0_20, %c0_21] : memref<1x128xi32, #tpu.memory_space<vmem>>, vector<1x128xi32>
    %c16_i32 = arith.constant 16 : i32
    %28 = vector.broadcast %c16_i32 : i32 to vector<1x128xi32>
    %29 = arith.cmpi slt, %27, %28 : vector<1x128xi32>
    %cst_22 = arith.constant 0.000000e+00 : f32
    %30 = vector.shape_cast %29 : vector<1x128xi1> to vector<1x128xi1>
    %31 = vector.broadcast %30 : vector<1x128xi1> to vector<8x128xi1>
    %32 = vector.broadcast %cst_22 : f32 to vector<8x128xf32>
    %33 = arith.select %31, %26, %32 : vector<8x128xi1>, vector<8x128xf32>
    %c0_23 = arith.constant 0 : index
    %c128_24 = arith.constant 128 : index
    %34 = vector.load %arg6[%c0_23, %c128_24] : memref<8x384xf32, #tpu.memory_space<vmem>>, vector<8x128xf32>
    tpu.vector_store %arg6[%c0_23, %c128_24], %33 {strides = array<i32>} : memref<8x384xf32, #tpu.memory_space<vmem>>, vector<8x128xf32>,
    %c1 = arith.constant 1 : index
    %c0_25 = arith.constant 0 : index
    %c0_26 = arith.constant 0 : index
    %c0_27 = arith.constant 0 : index
    %35 = vector.load %arg3[%c1, %c0_25, %c0_26, %c0_27] : memref<3x3x8x8xf32, #tpu.memory_space<vmem>>, vector<1x3x8x8xf32>
    %36 = vector.shape_cast %35 : vector<1x3x8x8xf32> to vector<3x8x8xf32>
    %c1_28 = arith.constant 1 : index
    %c0_29 = arith.constant 0 : index
    %c0_30 = arith.constant 0 : index
    %37 = vector.load %arg4[%c1_28, %c0_29, %c0_30] : memref<3x8x1xf32, #tpu.memory_space<vmem>>, vector<1x8x1xf32>
    %38 = vector.shape_cast %37 : vector<1x8x1xf32> to vector<8x1xf32>
    %39 = vector.extract_strided_slice %36 {offsets = [0, 0, 0], sizes = [1, 8, 8], strides = [1, 1, 1]} : vector<3x8x8xf32> to vector<1x8x8xf32>
    %40 = vector.shape_cast %39 : vector<1x8x8xf32> to vector<8x8xf32>
    %c0_31 = arith.constant 0 : index
    %c127_32 = arith.constant 127 : index
    %41 = vector.load %arg6[%c0_31, %c127_32] : memref<8x384xf32, #tpu.memory_space<vmem>>, vector<8x128xf32>
    %cst_33 = arith.constant dense<0.000000e+00> : vector<8x128xf32>
    %42 = tpu.matmul %40, %41, %cst_33 {dimension_numbers = #tpu.dot_dimension_numbers<[1], [0], [0], [1], [0, 0, 1, 1], [], []>} : vector<8x8xf32>, vector<8x128xf32>, vector<8x128xf32> -> vector<8x128xf32>
    %43 = vector.extract_strided_slice %36 {offsets = [1, 0, 0], sizes = [1, 8, 8], strides = [1, 1, 1]} : vector<3x8x8xf32> to vector<1x8x8xf32>
    %44 = vector.shape_cast %43 : vector<1x8x8xf32> to vector<8x8xf32>
    %c0_34 = arith.constant 0 : index
    %c128_35 = arith.constant 128 : index
    %45 = vector.load %arg6[%c0_34, %c128_35] : memref<8x384xf32, #tpu.memory_space<vmem>>, vector<8x128xf32>
    %cst_36 = arith.constant dense<0.000000e+00> : vector<8x128xf32>
    %46 = tpu.matmul %44, %45, %cst_36 {dimension_numbers = #tpu.dot_dimension_numbers<[1], [0], [0], [1], [0, 0, 1, 1], [], []>} : vector<8x8xf32>, vector<8x128xf32>, vector<8x128xf32> -> vector<8x128xf32>
    %47 = arith.addf %42, %46 : vector<8x128xf32>
    %48 = vector.extract_strided_slice %36 {offsets = [2, 0, 0], sizes = [1, 8, 8], strides = [1, 1, 1]} : vector<3x8x8xf32> to vector<1x8x8xf32>
    %49 = vector.shape_cast %48 : vector<1x8x8xf32> to vector<8x8xf32>
    %c0_37 = arith.constant 0 : index
    %c129_38 = arith.constant 129 : index
    %50 = vector.load %arg6[%c0_37, %c129_38] : memref<8x384xf32, #tpu.memory_space<vmem>>, vector<8x128xf32>
    %cst_39 = arith.constant dense<0.000000e+00> : vector<8x128xf32>
    %51 = tpu.matmul %49, %50, %cst_39 {dimension_numbers = #tpu.dot_dimension_numbers<[1], [0], [0], [1], [0, 0, 1, 1], [], []>} : vector<8x8xf32>, vector<8x128xf32>, vector<8x128xf32> -> vector<8x128xf32>
    %52 = arith.addf %47, %51 : vector<8x128xf32>
    %53 = vector.broadcast %38 : vector<8x1xf32> to vector<8x128xf32>
    %54 = arith.addf %52, %53 : vector<8x128xf32>
    %cst_40 = arith.constant 0.000000e+00 : f32
    %55 = vector.broadcast %cst_40 : f32 to vector<8x128xf32>
    %56 = arith.maximumf %54, %55 : vector<8x128xf32>
    %c0_41 = arith.constant 0 : index
    %c0_42 = arith.constant 0 : index
    %57 = vector.load %arg2[%c0_41, %c0_42] : memref<1x128xi32, #tpu.memory_space<vmem>>, vector<1x128xi32>
    %c16_i32_43 = arith.constant 16 : i32
    %58 = vector.broadcast %c16_i32_43 : i32 to vector<1x128xi32>
    %59 = arith.cmpi slt, %57, %58 : vector<1x128xi32>
    %cst_44 = arith.constant 0.000000e+00 : f32
    %60 = vector.shape_cast %59 : vector<1x128xi1> to vector<1x128xi1>
    %61 = vector.broadcast %60 : vector<1x128xi1> to vector<8x128xi1>
    %62 = vector.broadcast %cst_44 : f32 to vector<8x128xf32>
    %63 = arith.select %61, %56, %62 : vector<8x128xi1>, vector<8x128xf32>
    %c0_45 = arith.constant 0 : index
    %c128_46 = arith.constant 128 : index
    %64 = vector.load %arg6[%c0_45, %c128_46] : memref<8x384xf32, #tpu.memory_space<vmem>>, vector<8x128xf32>
    tpu.vector_store %arg6[%c0_45, %c128_46], %63 {strides = array<i32>} : memref<8x384xf32, #tpu.memory_space<vmem>>, vector<8x128xf32>,
    %c2 = arith.constant 2 : index
    %c0_47 = arith.constant 0 : index
    %c0_48 = arith.constant 0 : index
    %c0_49 = arith.constant 0 : index
    %65 = vector.load %arg3[%c2, %c0_47, %c0_48, %c0_49] : memref<3x3x8x8xf32, #tpu.memory_space<vmem>>, vector<1x3x8x8xf32>
    %66 = vector.shape_cast %65 : vector<1x3x8x8xf32> to vector<3x8x8xf32>
    %c2_50 = arith.constant 2 : index
    %c0_51 = arith.constant 0 : index
    %c0_52 = arith.constant 0 : index
    %67 = vector.load %arg4[%c2_50, %c0_51, %c0_52] : memref<3x8x1xf32, #tpu.memory_space<vmem>>, vector<1x8x1xf32>
    %68 = vector.shape_cast %67 : vector<1x8x1xf32> to vector<8x1xf32>
    %69 = vector.extract_strided_slice %66 {offsets = [0, 0, 0], sizes = [1, 8, 8], strides = [1, 1, 1]} : vector<3x8x8xf32> to vector<1x8x8xf32>
    %70 = vector.shape_cast %69 : vector<1x8x8xf32> to vector<8x8xf32>
    %c0_53 = arith.constant 0 : index
    %c127_54 = arith.constant 127 : index
    %71 = vector.load %arg6[%c0_53, %c127_54] : memref<8x384xf32, #tpu.memory_space<vmem>>, vector<8x128xf32>
    %cst_55 = arith.constant dense<0.000000e+00> : vector<8x128xf32>
    %72 = tpu.matmul %70, %71, %cst_55 {dimension_numbers = #tpu.dot_dimension_numbers<[1], [0], [0], [1], [0, 0, 1, 1], [], []>} : vector<8x8xf32>, vector<8x128xf32>, vector<8x128xf32> -> vector<8x128xf32>
    %73 = vector.extract_strided_slice %66 {offsets = [1, 0, 0], sizes = [1, 8, 8], strides = [1, 1, 1]} : vector<3x8x8xf32> to vector<1x8x8xf32>
    %74 = vector.shape_cast %73 : vector<1x8x8xf32> to vector<8x8xf32>
    %c0_56 = arith.constant 0 : index
    %c128_57 = arith.constant 128 : index
    %75 = vector.load %arg6[%c0_56, %c128_57] : memref<8x384xf32, #tpu.memory_space<vmem>>, vector<8x128xf32>
    %cst_58 = arith.constant dense<0.000000e+00> : vector<8x128xf32>
    %76 = tpu.matmul %74, %75, %cst_58 {dimension_numbers = #tpu.dot_dimension_numbers<[1], [0], [0], [1], [0, 0, 1, 1], [], []>} : vector<8x8xf32>, vector<8x128xf32>, vector<8x128xf32> -> vector<8x128xf32>
    %77 = arith.addf %72, %76 : vector<8x128xf32>
    %78 = vector.extract_strided_slice %66 {offsets = [2, 0, 0], sizes = [1, 8, 8], strides = [1, 1, 1]} : vector<3x8x8xf32> to vector<1x8x8xf32>
    %79 = vector.shape_cast %78 : vector<1x8x8xf32> to vector<8x8xf32>
    %c0_59 = arith.constant 0 : index
    %c129_60 = arith.constant 129 : index
    %80 = vector.load %arg6[%c0_59, %c129_60] : memref<8x384xf32, #tpu.memory_space<vmem>>, vector<8x128xf32>
    %cst_61 = arith.constant dense<0.000000e+00> : vector<8x128xf32>
    %81 = tpu.matmul %79, %80, %cst_61 {dimension_numbers = #tpu.dot_dimension_numbers<[1], [0], [0], [1], [0, 0, 1, 1], [], []>} : vector<8x8xf32>, vector<8x128xf32>, vector<8x128xf32> -> vector<8x128xf32>
    %82 = arith.addf %77, %81 : vector<8x128xf32>
    %83 = vector.broadcast %68 : vector<8x1xf32> to vector<8x128xf32>
    %84 = arith.addf %82, %83 : vector<8x128xf32>
    %c0_62 = arith.constant 0 : index
    %c0_63 = arith.constant 0 : index
    %c0_64 = arith.constant 0 : index
    %85 = vector.load %arg5[%c0_62, %c0_63, %c0_64] : memref<1x8x128xf32, #tpu.memory_space<vmem>>, vector<1x8x128xf32>
    %86 = vector.shape_cast %85 : vector<1x8x128xf32> to vector<8x128xf32>
    %87 = vector.shape_cast %84 : vector<8x128xf32> to vector<1x8x128xf32>
    tpu.vector_store %arg5[%c0_62, %c0_63, %c0_64], %87 {strides = array<i32>} : memref<1x8x128xf32, #tpu.memory_space<vmem>>, vector<1x8x128xf32>,
    return
  }
  func.func @transform_0(%arg0: i32) -> (i32, i32, i32) {
    %c0_i32 = arith.constant 0 : i32
    %c0_i32_0 = arith.constant 0 : i32
    %c0_i32_1 = arith.constant 0 : i32
    return %arg0, %c0_i32, %c0_i32_0 : i32, i32, i32
  }
  func.func @transform_1(%arg0: i32) -> (i32, i32) {
    %c0_i32 = arith.constant 0 : i32
    %c0_i32_0 = arith.constant 0 : i32
    %c0_i32_1 = arith.constant 0 : i32
    return %c0_i32, %c0_i32_0 : i32, i32
  }
  func.func @transform_2(%arg0: i32) -> (i32, i32, i32, i32) {
    %c0_i32 = arith.constant 0 : i32
    %c0_i32_0 = arith.constant 0 : i32
    %c0_i32_1 = arith.constant 0 : i32
    %c0_i32_2 = arith.constant 0 : i32
    %c0_i32_3 = arith.constant 0 : i32
    return %c0_i32, %c0_i32_0, %c0_i32_1, %c0_i32_2 : i32, i32, i32, i32
  }
  func.func @transform_3(%arg0: i32) -> (i32, i32, i32) {
    %c0_i32 = arith.constant 0 : i32
    %c0_i32_0 = arith.constant 0 : i32
    %c0_i32_1 = arith.constant 0 : i32
    %c0_i32_2 = arith.constant 0 : i32
    return %c0_i32, %c0_i32_0, %c0_i32_1 : i32, i32, i32
  }
  func.func @transform_4(%arg0: i32) -> (i32, i32, i32) {
    %c0_i32 = arith.constant 0 : i32
    %c0_i32_0 = arith.constant 0 : i32
    %c0_i32_1 = arith.constant 0 : i32
    return %arg0, %c0_i32, %c0_i32_0 : i32, i32, i32
  }
}

</mosaic_0001>

<bundles_post_ra>
// kernel: tpu_custom_call.1
= control target key start
LH: loop header
LB: loop body
LE: loop exit
PB: predicated region body
PF: predicated region fallthrough
CT: control target
= control target key end

     0   :  { %9 = vsyncpa [#allocation4], 0  ;;  %s1576_s0 = inlined_call_operand.vmem [shape: f32[2,8,128], index: 0, kind: input, shape index: {}]   ;;  %s1577_s1 = inlined_call_operand.vmem [shape: s32[1,128], index: 1, kind: input, shape index: {}]   ;;  %s1578_s2 = inlined_call_operand.hbm [shape: f32[3,3,8,8], index: 2, kind: input, shape index: {}]   ;;  %s1579_s3 = inlined_call_operand.vmem [shape: f32[3,8,1], index: 3, kind: input, shape index: {}]   ;;  %s1580_s4 = inlined_call_operand.hbm [shape: f32[2,8,128], index: 4, kind: output, shape index: {}]  }
   0x1   :  { %10 = vsyncpa [#allocation5], 0 }
   0x2   :  { %12 = vsyncpa [#allocation5 + $0x1], 0  ;;  %s1361_s15 = smov 0   ;;  %s1363_s16 = smov 0  }
   0x3   :  { %s1365_s17 = smov 0   ;;  %s1367_s18 = smov 0  }
   0x4 LB: > { %s1382_s19 = sadd.s32 4294967295, %s1325_s18   ;;  %s1084_s20 = sadd.s32 4294967294, %s1325_s18   ;;  %s1325_s18 = sphi %s1367_s18, %s1596_s18   ;;  %s1321_s17 = sphi %s1365_s17, %s1595_s17   ;;  %s1317_s16 = sphi %s1363_s16, %s1594_s16   ;;  %s1313_s15 = sphi %s1361_s15, %s1593_s15  }
   0x5   : > { %s1386_s21 = sadd.s32 1, %s1325_s18   ;;  %s114_s22 = sadd.s32 1, %s1321_s17 }
   0x6   : > { %s111_s23 = ssub.s32 %s1325_s18, %s1386_s21  ;;  %p124_p0 = scmp.ne.s32.totalorder %s1321_s17, %s1317_s16 }
   0x7   : > { %p112_p1 = scmp.eq.s32.totalorder %s111_s23, 0  ;;  %p125_p2 = scmp.eq.s32.totalorder %s1382_s19, 1 }
   0x8   : > { %p130_p3 = scmp.ne.s32.totalorder %s1317_s16, %s1313_s15  ;;  %p131_p4 = scmp.eq.s32.totalorder %s1084_s20, 1 }
   0x9   : > { %s1397_s24 = scalar_select %p112_p1, %s1321_s17, %s114_s22  }
   0xa   : > { %p1399_p5 = por %p125_p2, %p124_p0  ;;  %p1403_p6 = por %p131_p4, %p130_p3 }
   0xb   : > { %p1085_p7 = scmp.ge.s32.totalorder %s1325_s18, 1  ;;  %p138_p8 = scmp.lt.s32.totalorder %s1325_s18, 3 }
   0xc   : > { %s1584_s25 = scalar_select %p1399_p5, 1, 0 }
   0xd   : > { %s1585_s26 = scalar_select %p1403_p6, 1, 0 }
   0xe   : > { %p1581_p9 = scmp.eq.s32.totalorder %s1382_s19, 0  ;;  %p1410_p10 = pnand %p1085_p7, %p138_p8 }
   0xf   : > { %s1327_s28 = smov [#allocation3]   ;;  %s1231_s7 = scalar_lea.hbm %s1578_s2, 1152 }
  0x10   : > { %s1586_s27 = scalar_select %p1410_p10, 1, 0 }
  0x11   : > { %s153_s29 = sshll.u32 %s1327_s28, 4  ;;  %p1176_p11 = pneg %p1410_p10  ;;  %s154_s29 = int_to_ptr.vmem [resolvable:$true] %s153_s29 }
  0x12   : > { %p1232_p13 = scmp.ne.s32.totalorder %s1578_s2, %s1231_s7  ;;  %p1238_p3 = scmp.lt.u32.totalorder %s1231_s7, %s1578_s2 }
  0x13   : > { %p1418_p12 = pnand %p1581_p9, %p1176_p11 }
  0x15   : > { %p1233_p0 = pneg %p1418_p12 }
  0x17   : > { %p1234_p1 = pnand %p1233_p0, %p1232_p13 }
  0x19   : > { %p1235_p2 = pneg %p1234_p1 }
  0x1b   : > { %p1240_p4 = pnand %p1238_p3, %p1235_p2 }
  0x1d   : > { %1243 = shalt.err (!%p1240_p4)
}
  0x1e   : > { %s1244_s12 = scalar_lea.vmem %s154_s29, 1152  ;;  %p1252_p9 = scmp.lt.s32.totalorder %s154_s29, %s154_s29 }
  0x1f   : > { %p1245_p7 = scmp.ne.s32.totalorder %s154_s29, %s1244_s12  ;;  %p1253_p6 = scmp.lt.s32.totalorder %s1244_s12, %s1244_s12 }
  0x21   : > { %p1247_p8 = pnand %p1245_p7, %p1233_p0  ;;  %p1254_p5 = por %p1253_p6, %p1252_p9 }
  0x23   : > { %p1248_p11 = pneg %p1247_p8 }
  0x25   : > { %p1255_p10 = pnand %p1254_p5, %p1248_p11 }
  0x27   : > { %1258 = shalt.err (!%p1255_p10)
}
  0x28   : > { %s1328_s13 = smov 128   ;;  %s1329_s14 = smov 8  }
  0x29   : > { %1179 = dma.hbm_to_vmem [thread:$0]  (!%p1418_p12), %s1578_s2, 1152, %s154_s29, [#allocation4], %s1328_s13, %s1328_s13, %s1329_s14  }
  0x2a   : > { %p1588_p13 = scmp.ne.s32.totalorder %s1586_s27, 0 }
  0x2b   : > { %p1589_p1 = scmp.eq.s32.totalorder (!%p1588_p13), %s1382_s19, 0 }
  0x2c   : > { %179 = sbr.rel (%p1588_p13) target bundleno = 1214 (0x4be), region = 36 }
  0x33   : > { %1304 = dma.done.wait (%p1589_p1), [#allocation4], 1152   ;;  %p1590_p0 = pmov %p1589_p1 }
  0x34   : > { %p204_p5 = scmp.lt.s32.totalorder %s1382_s19, 1  ;;  %v1330_v0 = vmov 0.0   ;;  %s1331_s5 = smov 127   ;;  %vm1332_vm0 = vmmov 0   ;;  %vm216_vm1 = vcmask 1048568   ;;  %vm218_vm2 = vcmask 1039360  }
  0x35   : > { %1306 = vsyncadd (%p1590_p0), [#allocation4], 4294966144  ;;  %208 = vst [vmem:[#allocation2] sm:$0xff] %v1330_v0  ;;  %1125 = vmatprep.subr.mxu0 %v1330_v0  ;;  %1130 = vmatprep.subr.mxu1 %v1330_v0  ;;  %v1333_v3 = vmov 0   ;;  %v221_v4 = vld [vmem:[#allocation3 + $0x8] sm:$0xff]  ;;  %vm226_vm3 = vcmask 64512   ;;  %v476_v18 = vlaneseq }
  0x36   : > { %209 = vst [vmem:[#allocation2 + $0x8] sm:$0xff] %v1330_v0  ;;  %s205_s23 = scalar_select %p204_p5, %s1382_s19, 1  ;;  %1127 = vmatprep.mubr.msk.f32.mxu0 %vm1332_vm0, %v1330_v0  ;;  %1132 = vmatprep.mubr.msk.f32.mxu1 %vm1332_vm0, %v1330_v0  ;;  %v223_v7 = vld [vmem:[%s1579_s3] sm:$0xff]  ;;  %vm306_vm4 = vcmask 7168   ;;  %v220_v10 = vld [vmem:[#allocation3] sm:$0xff]  ;;  %v222_v14 = vld [vmem:[#allocation3 + $0x10] sm:$0xff] }
  0x37   : > { %1227 = vset.pattern.permute.xlu1 %v1333_v3  ;;  %1228 = vset.pattern.permute.xlu0 %v1333_v3  ;;  %s1334_s6 = smov 1   ;;  %v473_v19 = vld [vmem:[%s1577_s1] sm:$0x1]  ;;  %v477_v20 = vshrl.u32 %v476_v18, 7  ;;  %v485_v34 = vld [vmem:[#allocation3 + $0x20] sm:$0xff]  ;;  %v1095_v35 = vld [vmem:[%s1579_s3 + $0x8] sm:$0xff] }
  0x38   : > { %s1091_s27 = sshll.u32 %s205_s23, 3  ;;  %vm474_vm5 = vcmp.lt.s32.totalorder %v473_v19, 16  ;;  %v484_v38 = vld [vmem:[#allocation3 + $0x18] sm:$0xff]  ;;  %v486_v42 = vld [vmem:[#allocation3 + $0x28] sm:$0xff]  ;;  %v747_v63 = vld [vmem:[#allocation3 + $0x30] sm:$0xff]  ;;  %s201_s23 = sand.u32 1, %s1317_s16  }
  0x39   : > { %s207_s30 = scalar_lea.vmem %s1576_s0, %s1091_s27  ;;  %v478_v22 = vsub.s32 0, %v477_v20  ;;  %v475_v25 = vsel %vm474_vm5, 1, %v1333_v3  ;;  %v736_v46 = vld [vmem:[%s1577_s1] sm:$0x1]  ;;  %v748_v59 = vld [vmem:[#allocation3 + $0x38] sm:$0xff]  ;;  %s1090_s27 = sshll.u32 %s201_s23, 3 }
  0x3a   : > { %v211_v1 = vld [vmem:[%s207_s30] sm:$0xff]  ;;  %vm737_vm7 = vcmp.lt.s32.totalorder %v736_v46, 16  ;;  %v1099_v60 = vld [vmem:[%s1579_s3 + $0x10] sm:$0xff]  ;;  %s1104_s28 = sshll.u32 %s1382_s19, 7  ;;  %s203_s29 = scalar_lea.vmem [#allocation6], %s1090_s27 }
  0x3b   : > { %213 = vrot.lane.b32.xlu0 %v211_v1, %s1331_s5  ;;  %v479_v27 = vrot.slane %v475_v25, %v478_v22  ;;  %v738_v50 = vsel %vm737_vm7, 1, %v1333_v3  ;;  %s1013_s30 = sshll.u32 %s203_s29, 4  ;;  %s1534_s7 = scalar_lea.hbm %s1580_s4, %s1104_s28  ;;  %s1536_s30 = int_to_ptr.vmem [resolvable:$true] %s1013_s30 }
  0x3c   : > { %v742_v52 = vrot.slane %v738_v50, %v478_v22  ;;  %s1000_s8 = scalar_lea.sflag [#allocation5], %s201_s23  ;;  %s1259_s9 = scalar_lea.vmem %s1536_s30, 128 }
  0x3d   : > { %vm480_vm6 = vcmp.eq.s32.totalorder %v479_v27, 1  ;;  %p1260_p6 = scmp.ne.s32.totalorder %s1536_s30, %s1259_s9  ;;  %p1591_p9 = scmp.ne.s32.totalorder %s1584_s25, 0 }
  0x3e   : > { %vm743_vm8 = vcmp.eq.s32.totalorder %v742_v52, 1  ;;  %s1335_s19 = smov [#allocation6]  }
  0x3f   : > { %p1261_p10 = pnand %p1260_p6, %p1591_p9  ;;  %s1263_s10 = sshll.u32 %s1335_s19, 4  ;;  %s1264_s10 = int_to_ptr.vmem [resolvable:$false] %s1263_s10 }
  0x40   : > { %s1265_s11 = scalar_lea.vmem %s1264_s10, 256  ;;  %p1266_p2 = scmp.lt.s32.totalorder %s1536_s30, %s1264_s10 }
  0x41   : > { %p1262_p12 = pneg %p1261_p10  ;;  %p1267_p3 = scmp.lt.s32.totalorder %s1265_s11, %s1259_s9 }
  0x43   : > { %p1268_p4 = por %p1267_p3, %p1266_p2 }
  0x45   : > { %p1269_p7 = pnand %p1268_p4, %p1262_p12 }
  0xad   : > { %v214_v2 = vpop.permute.xlu0 %213 }
  0xae   : > { %217 = vst.msk [vmem:[#allocation2] sm:$0xff] %vm216_vm1, %v214_v2 }
  0xaf   : > { %219 = vst.msk [vmem:[#allocation2 + $0x8] sm:$0xff] %vm218_vm2, %v214_v2 }
  0xb5   : > { %v224_v6 = vld [vmem:[#allocation2] sm:$0xff] }
  0xb6   : > { %v225_v5 = vld [vmem:[#allocation2 + $0x8] sm:$0xff]  ;;  %302 = vrot.lane.b32.xlu0 %v224_v6, %s1334_s6 }
  0xb7   : > { %304 = vrot.lane.b32.xlu1 %v225_v5, %s1334_s6  ;;  %1126 = vmatpush3.msra.mxu0 %v225_v5 }
  0xb8   : > { %1128 = vmatmul.mubr.msk.f32.vlgmr.msra.gmra.mrb[0].mxu0 %vm226_vm3, %v221_v4  ;;  %1135 = vmatprep.subr.mxu0 %v1330_v0  ;;  %v749_v4 = vld [vmem:[#allocation3 + $0x40] sm:$0xff] }
  0xb9   : > { %1137 = vmatprep.mubr.msk.f32.mxu0 %vm1332_vm0, %v1330_v0 }
  0xba   : > { %388 = vrot.lane.b32.xlu0 %v1330_v0, %s1331_s5 }
  0xbb   : > { %386 = vrot.lane.b32.xlu1 %v225_v5, %s1331_s5 }
  0xbe   : > { %566 = vrot.lane.b32.xlu0 %v224_v6, %s1334_s6 }
  0xbf   : > { %468 = vperm.xlu1 %1227, %v223_v7  }
 0x128   : > { %v303_v9 = vpop.permute.xlu0 %302 }
 0x129   : > { %v305_v8 = vpop.permute.xlu1 %304 }
 0x12a   : > { %v307_v11 = vsel %vm306_vm4, %v303_v9, %v305_v8 }
 0x12b   : > { %1131 = vmatpush3.msra.mxu1 %v307_v11 }
 0x12c   : > { %1133 = vmatmul.mubr.msk.f32.vlgmr.msra.gmra.mrb[0].mxu1 %vm226_vm3, %v220_v10  ;;  %1140 = vmatprep.subr.mxu1 %v1330_v0  ;;  %v389_v13 = vpop.permute.xlu0 %388 }
 0x12d   : > { %v387_v12 = vpop.permute.xlu1 %386  ;;  %1142 = vmatprep.mubr.msk.f32.mxu1 %vm1332_vm0, %v1330_v0 }
 0x12e   : > { %v390_v15 = vsel %vm218_vm2, %v387_v12, %v389_v13 }
 0x12f   : > { %1136 = vmatpush3.msra.mxu0 %v390_v15 }
 0x130   : > { %1138 = vmatmul.mubr.msk.f32.vlgmr.msra.gmra.mrb[2].mxu0 %vm226_vm3, %v222_v14  ;;  %1145 = vmatprep.subr.mxu0 %v1330_v0  ;;  %v567_v36 = vpop.permute.xlu0 %566 }
 0x131   : > { %1147 = vmatprep.mubr.msk.f32.mxu0 %vm1332_vm0, %v1330_v0 }
 0x13e   : > { %v469_v28 = vpop.permute.xlu1 %468 }
 0x18b   : > { %v296_v16 = vpop.f32.mrb[0].mxu0 }
 0x18c   : > { %v1129_v17 = vpop.f32.mrb[1].mxu0 }
 0x1ff   : > { %v378_v21 = vpop.f32.mrb[0].mxu1 }
 0x200   : > { %v379_v23 = vadd.f32 %v378_v21, %v296_v16  ;;  %v1134_v24 = vpop.f32.mrb[1].mxu1 }
 0x203   : > { %v461_v26 = vpop.f32.mrb[2].mxu0 }
 0x204   : > { %v465_v29 = vadd.f32 %v461_v26, %v379_v23  ;;  %v1139_v30 = vpop.f32.mrb[3].mxu0 }
 0x206   : > { %v471_v31 = vadd.f32 %v469_v28, %v465_v29 }
 0x208   : > { %v472_v32 = vmax.f32 %v471_v31, 0.0 }
 0x20a   : > { %v481_v33 = vsel %vm480_vm6, %v472_v32, 0.0  ;;  %1229 = vmatpush3.msk.msra.mxu1 %vm480_vm6, %v472_v32 }
 0x20b   : > { %649 = vrot.lane.b32.xlu0 %v481_v33, %s1331_s5  ;;  %568 = vrot.lane.b32.xlu1 %v481_v33, %s1334_s6 }
 0x20c   : > { %1143 = vmatmul.mubr.msk.f32.vlgmr.msra.gmra.mrb[2].mxu1 %vm226_vm3, %v485_v34  ;;  %1150 = vmatprep.subr.mxu1 %v1330_v0 }
 0x20d   : > { %1152 = vmatprep.mubr.msk.f32.mxu1 %vm1332_vm0, %v1330_v0 }
 0x20f   : > { %651 = vrot.lane.b32.xlu1 %v1330_v0, %s1331_s5  ;;  %731 = vperm.xlu0 %1228, %v1095_v35  }
 0x213   : > { %829 = vrot.lane.b32.xlu1 %v224_v6, %s1334_s6 }
 0x27d   : > { %v569_v37 = vpop.permute.xlu1 %568  ;;  %v650_v40 = vpop.permute.xlu0 %649 }
 0x27e   : > { %v570_v39 = vsel %vm306_vm4, %v567_v36, %v569_v37 }
 0x27f   : > { %1146 = vmatpush3.msra.mxu0 %v570_v39 }
 0x280   : > { %1148 = vmatmul.mubr.msk.f32.vlgmr.msra.gmra.mrb[4].mxu0 %vm226_vm3, %v484_v38  ;;  %1155 = vmatprep.subr.mxu0 %v1330_v0 }
 0x281   : > { %v652_v41 = vpop.permute.xlu1 %651  ;;  %1157 = vmatprep.mubr.msk.f32.mxu0 %vm1332_vm0, %v1330_v0 }
 0x282   : > { %v653_v43 = vsel %vm218_vm2, %v650_v40, %v652_v41 }
 0x283   : > { %1151 = vmatpush3.msra.mxu1 %v653_v43 }
 0x284   : > { %1153 = vmatmul.mubr.msk.f32.vlgmr.msra.gmra.mrb[4].mxu1 %vm226_vm3, %v486_v42  ;;  %1160 = vmatprep.subr.mxu1 %v1330_v0 }
 0x285   : > { %1162 = vmatprep.mubr.msk.f32.mxu1 %vm1332_vm0, %v1330_v0  ;;  %v830_v61 = vpop.permute.xlu1 %829 }
 0x28e   : > { %v732_v53 = vpop.permute.xlu0 %731 }
 0x2df   : > { %v560_v44 = vpop.f32.mrb[2].mxu1 }
 0x2e0   : > { %v1144_v45 = vpop.f32.mrb[3].mxu1 }
 0x353   : > { %v641_v47 = vpop.f32.mrb[4].mxu0 }
 0x354   : > { %v642_v48 = vadd.f32 %v641_v47, %v560_v44  ;;  %v1149_v49 = vpop.f32.mrb[5].mxu0 }
 0x357   : > { %v724_v51 = vpop.f32.mrb[4].mxu1 }
 0x358   : > { %v728_v54 = vadd.f32 %v724_v51, %v642_v48  ;;  %v1154_v55 = vpop.f32.mrb[5].mxu1 }
 0x35a   : > { %v734_v56 = vadd.f32 %v732_v53, %v728_v54 }
 0x35c   : > { %v735_v57 = vmax.f32 %v734_v56, 0.0 }
 0x35e   : > { %v744_v58 = vsel %vm743_vm8, %v735_v57, 0.0  ;;  %1230 = vmatpush3.msk.msra.mxu0 %vm743_vm8, %v735_v57 }
 0x35f   : > { %745 = vst [vmem:[#allocation2 + $0x8] sm:$0xff] %v744_v58  ;;  %912 = vrot.lane.b32.xlu0 %v744_v58, %s1331_s5  ;;  %831 = vrot.lane.b32.xlu1 %v744_v58, %s1334_s6 }
 0x360   : > { %1158 = vmatmul.mubr.msk.f32.vlgmr.msra.gmra.mrb[6].mxu0 %vm226_vm3, %v748_v59  ;;  %1165 = vmatprep.subr.mxu0 %v1330_v0 }
 0x361   : > { %1167 = vmatprep.mubr.msk.f32.mxu0 %vm1332_vm0, %v1330_v0 }
 0x363   : > { %994 = vperm.xlu0 %1228, %v1099_v60   ;;  %914 = vrot.lane.b32.xlu1 %v1330_v0, %s1331_s5 }
 0x3d1   : > { %v832_v62 = vpop.permute.xlu1 %831  ;;  %v913_v2 = vpop.permute.xlu0 %912 }
 0x3d2   : > { %v833_v1 = vsel %vm306_vm4, %v830_v61, %v832_v62 }
 0x3d3   : > { %1161 = vmatpush3.msra.mxu1 %v833_v1 }
 0x3d4   : > { %1163 = vmatmul.mubr.msk.f32.vlgmr.msra.gmra.mrb[6].mxu1 %vm226_vm3, %v747_v63 }
 0x3d5   : > { %v915_v3 = vpop.permute.xlu1 %914 }
 0x3d6   : > { %v916_v5 = vsel %vm218_vm2, %v913_v2, %v915_v3 }
 0x3d7   : > { %1166 = vmatpush3.msra.mxu0 %v916_v5 }
 0x3d8   : > { %1168 = vmatmul.mubr.msk.f32.vlgmr.msra.gmra.mrb[8].mxu0 %vm226_vm3, %v749_v4 }
 0x3e2   : > { %v995_v13 = vpop.permute.xlu0 %994 }
 0x433   : > { %v823_v6 = vpop.f32.mrb[6].mxu0 }
 0x434   : > { %v1159_v7 = vpop.f32.mrb[7].mxu0 }
 0x4a7   : > { %v904_v0 = vpop.f32.mrb[6].mxu1 }
 0x4a8   : > { %v905_v8 = vadd.f32 %v904_v0, %v823_v6  ;;  %v1164_v9 = vpop.f32.mrb[7].mxu1 }
 0x4ab   : > { %v987_v10 = vpop.f32.mrb[8].mxu0 }
 0x4ac   : > { %v991_v11 = vadd.f32 %v987_v10, %v905_v8  ;;  %v1169_v12 = vpop.f32.mrb[9].mxu0 }
 0x4ae   : > { %v997_v14 = vadd.f32 %v995_v13, %v991_v11 }
 0x4b0   : > { %998 = vst [vmem:[%s203_s29] sm:$0xff] %v997_v14 }
 0x4b1   : > { %1272 = shalt.err (!%p1269_p7)
}
 0x4b2   : > { %s1273_s12 = scalar_lea.hbm %s1534_s7, 128  ;;  %s1277_s20 = scalar_lea.hbm %s1580_s4, 256 }
 0x4b3   : > { %p1274_p8 = scmp.ne.s32.totalorder %s1534_s7, %s1273_s12  ;;  %p1278_p1 = scmp.lt.u32.totalorder %s1534_s7, %s1580_s4 }
 0x4b4   : > { %p1279_p0 = scmp.lt.u32.totalorder %s1277_s20, %s1273_s12  ;;  %p1281_p6 = scmp.lt.u32.totalorder %s1273_s12, %s1534_s7 }
 0x4b5   : > { %p1275_p11 = pnand %p1274_p8, %p1591_p9 }
 0x4b6   : > { %p1280_p5 = por %p1279_p0, %p1278_p1 }
 0x4b7   : > { %p1276_p13 = pneg %p1275_p11 }
 0x4b8   : > { %p1282_p10 = por %p1281_p6, %p1280_p5 }
 0x4ba   : > { %p1283_p12 = pnand %p1282_p10, %p1276_p13 }
 0x4bc   : > { %1286 = shalt.err (!%p1283_p12)
}
 0x4bd   : > { %1174 = dma.vmem_to_hbm [thread:$0]  (%p1591_p9), %s1536_s30, 128, %s1534_s7, %s1000_s8  }
 0x4be PF: > { %p1186_p2 = scmp.ge.s32.totalorder %s1325_s18, 2  ;;  %s1025_s27 = sand.u32 1, %s1313_s15  }
 0x4bf   : > { %p1592_p3 = scmp.ne.s32.totalorder %s1585_s26, 0  ;;  %s1026_s28 = scalar_lea.sflag [#allocation5], %s1025_s27 }
 0x4c1   : > { %p1181_p4 = pnand %p1186_p2, %p1592_p3 }
 0x4c3   : > { %1308 = dma.done.wait (!%p1181_p4), %s1026_s28, 128  }
 0x4c4   : > { %1310 = vsyncadd (!%p1181_p4), %s1026_s28, 4294967168  ;;  %p15_p7 = scmp.ge.s32.totalorder %s1386_s21, 4   ;;  %s1593_s15 = smov %s1317_s16 }
 0x4c5   : > { %s1594_s16 = smov %s1321_s17  ;;  %s1595_s17 = smov %s1397_s24 }
 0x4c6   : > { %s1596_s18 = smov %s1386_s21  ;;  %17 = sbr.rel (!%p15_p7) target bundleno = 4 (0x4), region = 80 }
 0x4cd   :  { %1031 = vsyncpa [#allocation4], 1 }
 0x4ce   :  { %1033 = vsyncpa [#allocation4 + $0x1], 1 }
 0x4cf   :  { %1034 = vsyncpa [#allocation5], 1 }
 0x4d0   :  { %1036 = vsyncpa [#allocation5 + $0x1], 1 }

</bundles_post_ra>
